<compile_context>
chip_gen: v5e
topology: v5e:2x2
jax: 0.10.0
libtpu: 0.0.40
codegen_flags: <defaults>
</compile_context>

<pallas_src>
import functools

import jax
import jax.numpy as jnp
from jax.experimental import pallas as pl
from jax.experimental.pallas import tpu as pltpu

HIDDEN = 256
LANE = 128


def _round_up(n, m):
    return (n + m - 1) // m * m


def _testnet_kernel(x0_ref, x1_ref, w0_ref, b0_ref, w1_ref, b1_ref,
                    wd_ref, bd_ref, wo_ref, bo_ref, out_ref):
    """Fused TestNet forward for one batch tile.

    x0_ref : [TM, K0]     f32   branch-0 input (full last dim)
    x1_ref : [TM, K1]     f32   branch-1 input (full last dim)
    w*_ref : bf16 weights (pre-transposed: [in, out]); b*_ref f32 biases [1, out]
    wo_ref : [H, N_pad]   bf16  lane-padded output weight
    bo_ref : [1, N_pad]   f32   lane-padded output bias
    out_ref: [TM, N_pad]  f32   lane-dense output tile
    """
    h0 = jnp.dot(x0_ref[...].astype(jnp.bfloat16), w0_ref[...],
                 preferred_element_type=jnp.float32)
    h0 = jnp.maximum(h0 + b0_ref[...], 0.0)

    h1 = jnp.dot(x1_ref[...].astype(jnp.bfloat16), w1_ref[...],
                 preferred_element_type=jnp.float32)
    h1 = jnp.maximum(h1 + b1_ref[...], 0.0)

    y = h0 + h1                                   # ReLU-before-sum semantics

    y = jnp.dot(y.astype(wd_ref.dtype), wd_ref[...],
                preferred_element_type=jnp.float32)
    y = jnp.maximum(y + bd_ref[...], 0.0)

    out = jnp.dot(y.astype(wo_ref.dtype), wo_ref[...],
                  preferred_element_type=jnp.float32)
    out_ref[...] = (out + bo_ref[...]).astype(out_ref.dtype)


def pack_params(params, out_dim):
    """One-time packing of TestNet weights (call at init, NOT per forward)."""
    (w0, b0), (w1, b1), (wd, bd), (wo, bo) = params
    n_pad = _round_up(out_dim, LANE)
    # Lane-pad the output projection so the final store is lane-dense (unmasked vst).
    wo_pad = jnp.zeros((HIDDEN, n_pad), jnp.float32).at[:, :out_dim].set(wo)
    bo_pad = jnp.zeros((1, n_pad), jnp.float32).at[:, :out_dim].set(bo)
    return (w0.astype(jnp.bfloat16), b0,
            w1.astype(jnp.bfloat16), b1,
            wd.astype(jnp.bfloat16), bd,
            wo_pad.astype(jnp.bfloat16), bo_pad)


def _choose_tiling(batch, tm_max):
    """Pick (tm, b_pad, grid).

    Small batch -> single grid step (no pipeline prologue/epilogue).
    Large batch -> big tiles, EVEN step count so v7x's 2 TCs both get work.
    """
    b8 = _round_up(batch, 8)
    if b8 <= tm_max:
        tm = b8
    else:
        n_steps = -(-b8 // tm_max)
        if n_steps % 2:
            n_steps += 1                 # even split for v7x megacore sharding
        tm = _round_up(-(-b8 // n_steps), 8)
    b_pad = _round_up(batch, tm)
    return tm, b_pad, (b_pad // tm,)


@functools.partial(jax.jit, static_argnames=("out_dim", "tm_max"))
def testnet_forward(x0, x1, packed, *, out_dim, tm_max=1024):
    w0, b0, w1, b1, wd, bd, wo, bo = packed
    batch, k0 = x0.shape
    k1 = x1.shape[1]
    n_pad = wo.shape[1]

    tm, b_pad, grid = _choose_tiling(batch, tm_max)
    if b_pad != batch:                       # only pad when actually needed
        pad = ((0, b_pad - batch), (0, 0))
        x0 = jnp.pad(x0, pad)
        x1 = jnp.pad(x1, pad)

    flops = 2 * b_pad * (k0 * HIDDEN + k1 * HIDDEN
                         + HIDDEN * HIDDEN + HIDDEN * n_pad)
    bytes_accessed = (x0.size * 4 + x1.size * 4
                      + (w0.size + w1.size + wd.size + wo.size) * 2
                      + (b0.size + b1.size + bd.size + bo.size) * 4
                      + b_pad * n_pad * 4)

    def row_spec(shape):
        return pl.BlockSpec(shape, lambda i: (i, 0))

    def const_spec(shape):
        return pl.BlockSpec(shape, lambda i: (0, 0))   # VMEM-resident weights

    out = pl.pallas_call(
        _testnet_kernel,
        out_shape=jax.ShapeDtypeStruct((b_pad, n_pad), jnp.float32),
        grid=grid,
        in_specs=[
            row_spec((tm, k0)),                 # x0 tile (full last dim)
            row_spec((tm, k1)),                 # x1 tile (full last dim)
            const_spec((k0, HIDDEN)),           # W0
            const_spec((1, HIDDEN)),            # b0 (f32)
            const_spec((k1, HIDDEN)),           # W1
            const_spec((1, HIDDEN)),            # b1 (f32)
            const_spec((HIDDEN, HIDDEN)),       # dense1 weight
            const_spec((1, HIDDEN)),            # dense1 bias (f32)
            const_spec((HIDDEN, n_pad)),        # output weight (lane-padded)
            const_spec((1, n_pad)),             # output bias (lane-padded, f32)
        ],
        out_specs=row_spec((tm, n_pad)),
        compiler_params=pltpu.CompilerParams(
            dimension_semantics=("parallel",)),
        cost_estimate=pl.CostEstimate(
            flops=flops, transcendentals=0, bytes_accessed=bytes_accessed),
    )(x0, x1, w0, b0, w1, b1, wd, bd, wo, bo)

    # TODO(synk): if the consumer can take the padded (b_pad, 128) slab, drop
    # this slice to save one wrapper op / HBM round-trip.
    return out[:batch, :out_dim]


def init_linear(key, fan_in, fan_out):
    """Deterministic init mirroring nn.Linear's U(-1/sqrt(fan_in), ...).

    Weight stored as [fan_in, fan_out] (pre-transposed vs. PyTorch).
    Bias stored as [1, fan_out] so it broadcasts cleanly on TPU.
    """
    kw, kb = jax.random.split(key)
    bound = 1.0 / jnp.sqrt(jnp.float32(fan_in))
    w = jax.random.uniform(kw, (fan_in, fan_out), jnp.float32, -bound, bound)
    b = jax.random.uniform(kb, (1, fan_out), jnp.float32, -bound, bound)
    return w, b


def reference_forward(x0, x1, params):
    """Pure-f32 JAX reference matching the PyTorch forward."""
    (w0, b0), (w1, b1), (wd, bd), (wo, bo) = params
    y = jnp.maximum(x0 @ w0 + b0, 0.0) + jnp.maximum(x1 @ w1 + b1, 0.0)
    y = jnp.maximum(y @ wd + bd, 0.0)
    return y @ wo + bo


if __name__ == "__main__":
    # TestNet(input_shape=[16, 32], output_shape=8); small batch that is NOT a
    # multiple of 8 so the pad-and-slice path is exercised (single grid step).
    batch = 12
    input_shapes = (16, 32)
    output_shape = 8

    key = jax.random.PRNGKey(0)
    k0, k1, k2, k3, kx0, kx1 = jax.random.split(key, 6)

    params = (
        init_linear(k0, input_shapes[0], HIDDEN),   # input_dense[0]
        init_linear(k1, input_shapes[1], HIDDEN),   # input_dense[1]
        init_linear(k2, HIDDEN, HIDDEN),            # dense1
        init_linear(k3, HIDDEN, output_shape),      # output_dense
    )

    # One-time packing (hoisted out of the per-call path).
    packed = pack_params(params, output_shape)

    x0 = jax.random.normal(kx0, (batch, input_shapes[0]), jnp.float32)
    x1 = jax.random.normal(kx1, (batch, input_shapes[1]), jnp.float32)

    out = jax.block_until_ready(
        testnet_forward(x0, x1, packed, out_dim=output_shape))
    ref = jax.block_until_ready(reference_forward(x0, x1, params))

    assert out.shape == (batch, output_shape), out.shape
    # bf16 MXU operands (f32 accumulation) -> relaxed tolerance vs f32 reference.
    max_err = float(jnp.max(jnp.abs(out - ref)))
    assert jnp.allclose(out, ref, atol=5e-2, rtol=5e-2), max_err
    print("KERNEL_OK")
</pallas_src>

<mosaic_0001>
module attributes {stable_mosaic.version = 11 : i64} {
  func.func @_testnet_kernel(%arg0: i32, %arg1: memref<16x16xf32, #tpu.memory_space<vmem>>, %arg2: memref<16x32xf32, #tpu.memory_space<vmem>>, %arg3: memref<16x256xbf16, #tpu.memory_space<vmem>>, %arg4: memref<1x256xf32, #tpu.memory_space<vmem>>, %arg5: memref<32x256xbf16, #tpu.memory_space<vmem>>, %arg6: memref<1x256xf32, #tpu.memory_space<vmem>>, %arg7: memref<256x256xbf16, #tpu.memory_space<vmem>>, %arg8: memref<1x256xf32, #tpu.memory_space<vmem>>, %arg9: memref<256x128xbf16, #tpu.memory_space<vmem>>, %arg10: memref<1x128xf32, #tpu.memory_space<vmem>>, %arg11: memref<16x128xf32, #tpu.memory_space<vmem>>) attributes {dimension_semantics = [#tpu.dimension_semantics<parallel>], iteration_bounds = array<i64: 1>, scalar_prefetch = 0 : i64, scratch_operands = 0 : i64, tpu.core_type = #tpu.core_type<tc>, window_params = [{transform_indices = @transform_0, window_bounds = array<i64: 16, 16>}, {transform_indices = @transform_1, window_bounds = array<i64: 16, 32>}, {pipeline_mode = #tpu.pipeline_mode<synchronous>, transform_indices = @transform_2, window_bounds = array<i64: 16, 256>}, {pipeline_mode = #tpu.pipeline_mode<synchronous>, transform_indices = @transform_3, window_bounds = array<i64: 1, 256>}, {pipeline_mode = #tpu.pipeline_mode<synchronous>, transform_indices = @transform_4, window_bounds = array<i64: 32, 256>}, {pipeline_mode = #tpu.pipeline_mode<synchronous>, transform_indices = @transform_5, window_bounds = array<i64: 1, 256>}, {pipeline_mode = #tpu.pipeline_mode<synchronous>, transform_indices = @transform_6, window_bounds = array<i64: 256, 256>}, {pipeline_mode = #tpu.pipeline_mode<synchronous>, transform_indices = @transform_7, window_bounds = array<i64: 1, 256>}, {pipeline_mode = #tpu.pipeline_mode<synchronous>, transform_indices = @transform_8, window_bounds = array<i64: 256, 128>}, {pipeline_mode = #tpu.pipeline_mode<synchronous>, transform_indices = @transform_9, window_bounds = array<i64: 1, 128>}, {transform_indices = @transform_10, window_bounds = array<i64: 16, 128>}]} {
    %c0 = arith.constant 0 : index
    %c0_0 = arith.constant 0 : index
    %0 = vector.load %arg1[%c0, %c0_0] : memref<16x16xf32, #tpu.memory_space<vmem>>, vector<16x16xf32>
    %1 = arith.truncf %0 : vector<16x16xf32> to vector<16x16xbf16>
    %c0_1 = arith.constant 0 : index
    %c0_2 = arith.constant 0 : index
    %2 = vector.load %arg3[%c0_1, %c0_2] : memref<16x256xbf16, #tpu.memory_space<vmem>>, vector<16x256xbf16>
    %cst = arith.constant dense<0.000000e+00> : vector<16x256xf32>
    %3 = tpu.matmul %1, %2, %cst {dimension_numbers = #tpu.dot_dimension_numbers<[1], [0], [0], [1], [0, 0, 1, 1], [], []>} : vector<16x16xbf16>, vector<16x256xbf16>, vector<16x256xf32> -> vector<16x256xf32>
    %c0_3 = arith.constant 0 : index
    %c0_4 = arith.constant 0 : index
    %4 = vector.load %arg4[%c0_3, %c0_4] : memref<1x256xf32, #tpu.memory_space<vmem>>, vector<1x256xf32>
    %5 = vector.broadcast %4 : vector<1x256xf32> to vector<16x256xf32>
    %6 = arith.addf %3, %5 : vector<16x256xf32>
    %cst_5 = arith.constant 0.000000e+00 : f32
    %7 = vector.broadcast %cst_5 : f32 to vector<16x256xf32>
    %8 = arith.maximumf %6, %7 : vector<16x256xf32>
    %c0_6 = arith.constant 0 : index
    %c0_7 = arith.constant 0 : index
    %9 = vector.load %arg2[%c0_6, %c0_7] : memref<16x32xf32, #tpu.memory_space<vmem>>, vector<16x32xf32>
    %10 = arith.truncf %9 : vector<16x32xf32> to vector<16x32xbf16>
    %c0_8 = arith.constant 0 : index
    %c0_9 = arith.constant 0 : index
    %11 = vector.load %arg5[%c0_8, %c0_9] : memref<32x256xbf16, #tpu.memory_space<vmem>>, vector<32x256xbf16>
    %cst_10 = arith.constant dense<0.000000e+00> : vector<16x256xf32>
    %12 = tpu.matmul %10, %11, %cst_10 {dimension_numbers = #tpu.dot_dimension_numbers<[1], [0], [0], [1], [0, 0, 1, 1], [], []>} : vector<16x32xbf16>, vector<32x256xbf16>, vector<16x256xf32> -> vector<16x256xf32>
    %c0_11 = arith.constant 0 : index
    %c0_12 = arith.constant 0 : index
    %13 = vector.load %arg6[%c0_11, %c0_12] : memref<1x256xf32, #tpu.memory_space<vmem>>, vector<1x256xf32>
    %14 = vector.broadcast %13 : vector<1x256xf32> to vector<16x256xf32>
    %15 = arith.addf %12, %14 : vector<16x256xf32>
    %cst_13 = arith.constant 0.000000e+00 : f32
    %16 = vector.broadcast %cst_13 : f32 to vector<16x256xf32>
    %17 = arith.maximumf %15, %16 : vector<16x256xf32>
    %18 = arith.addf %8, %17 : vector<16x256xf32>
    %19 = arith.truncf %18 : vector<16x256xf32> to vector<16x256xbf16>
    %c0_14 = arith.constant 0 : index
    %c0_15 = arith.constant 0 : index
    %20 = vector.load %arg7[%c0_14, %c0_15] : memref<256x256xbf16, #tpu.memory_space<vmem>>, vector<256x256xbf16>
    %cst_16 = arith.constant dense<0.000000e+00> : vector<16x256xf32>
    %21 = tpu.matmul %19, %20, %cst_16 {dimension_numbers = #tpu.dot_dimension_numbers<[1], [0], [0], [1], [0, 0, 1, 1], [], []>} : vector<16x256xbf16>, vector<256x256xbf16>, vector<16x256xf32> -> vector<16x256xf32>
    %c0_17 = arith.constant 0 : index
    %c0_18 = arith.constant 0 : index
    %22 = vector.load %arg8[%c0_17, %c0_18] : memref<1x256xf32, #tpu.memory_space<vmem>>, vector<1x256xf32>
    %23 = vector.broadcast %22 : vector<1x256xf32> to vector<16x256xf32>
    %24 = arith.addf %21, %23 : vector<16x256xf32>
    %cst_19 = arith.constant 0.000000e+00 : f32
    %25 = vector.broadcast %cst_19 : f32 to vector<16x256xf32>
    %26 = arith.maximumf %24, %25 : vector<16x256xf32>
    %27 = arith.truncf %26 : vector<16x256xf32> to vector<16x256xbf16>
    %c0_20 = arith.constant 0 : index
    %c0_21 = arith.constant 0 : index
    %28 = vector.load %arg9[%c0_20, %c0_21] : memref<256x128xbf16, #tpu.memory_space<vmem>>, vector<256x128xbf16>
    %cst_22 = arith.constant dense<0.000000e+00> : vector<16x128xf32>
    %29 = tpu.matmul %27, %28, %cst_22 {dimension_numbers = #tpu.dot_dimension_numbers<[1], [0], [0], [1], [0, 0, 1, 1], [], []>} : vector<16x256xbf16>, vector<256x128xbf16>, vector<16x128xf32> -> vector<16x128xf32>
    %c0_23 = arith.constant 0 : index
    %c0_24 = arith.constant 0 : index
    %30 = vector.load %arg10[%c0_23, %c0_24] : memref<1x128xf32, #tpu.memory_space<vmem>>, vector<1x128xf32>
    %31 = vector.broadcast %30 : vector<1x128xf32> to vector<16x128xf32>
    %32 = arith.addf %29, %31 : vector<16x128xf32>
    %c0_25 = arith.constant 0 : index
    %c0_26 = arith.constant 0 : index
    %33 = vector.load %arg11[%c0_25, %c0_26] : memref<16x128xf32, #tpu.memory_space<vmem>>, vector<16x128xf32>
    tpu.vector_store %arg11[%c0_25, %c0_26], %32 {strides = array<i32>} : memref<16x128xf32, #tpu.memory_space<vmem>>, vector<16x128xf32>,
    return
  }
  func.func @transform_0(%arg0: i32) -> (i32, i32) {
    %c0_i32 = arith.constant 0 : i32
    %c0_i32_0 = arith.constant 0 : i32
    return %arg0, %c0_i32 : i32, i32
  }
  func.func @transform_1(%arg0: i32) -> (i32, i32) {
    %c0_i32 = arith.constant 0 : i32
    %c0_i32_0 = arith.constant 0 : i32
    return %arg0, %c0_i32 : i32, i32
  }
  func.func @transform_2(%arg0: i32) -> (i32, i32) {
    %c0_i32 = arith.constant 0 : i32
    %c0_i32_0 = arith.constant 0 : i32
    %c0_i32_1 = arith.constant 0 : i32
    return %c0_i32, %c0_i32_0 : i32, i32
  }
  func.func @transform_3(%arg0: i32) -> (i32, i32) {
    %c0_i32 = arith.constant 0 : i32
    %c0_i32_0 = arith.constant 0 : i32
    %c0_i32_1 = arith.constant 0 : i32
    return %c0_i32, %c0_i32_0 : i32, i32
  }
  func.func @transform_4(%arg0: i32) -> (i32, i32) {
    %c0_i32 = arith.constant 0 : i32
    %c0_i32_0 = arith.constant 0 : i32
    %c0_i32_1 = arith.constant 0 : i32
    return %c0_i32, %c0_i32_0 : i32, i32
  }
  func.func @transform_5(%arg0: i32) -> (i32, i32) {
    %c0_i32 = arith.constant 0 : i32
    %c0_i32_0 = arith.constant 0 : i32
    %c0_i32_1 = arith.constant 0 : i32
    return %c0_i32, %c0_i32_0 : i32, i32
  }
  func.func @transform_6(%arg0: i32) -> (i32, i32) {
    %c0_i32 = arith.constant 0 : i32
    %c0_i32_0 = arith.constant 0 : i32
    %c0_i32_1 = arith.constant 0 : i32
    return %c0_i32, %c0_i32_0 : i32, i32
  }
  func.func @transform_7(%arg0: i32) -> (i32, i32) {
    %c0_i32 = arith.constant 0 : i32
    %c0_i32_0 = arith.constant 0 : i32
    %c0_i32_1 = arith.constant 0 : i32
    return %c0_i32, %c0_i32_0 : i32, i32
  }
  func.func @transform_8(%arg0: i32) -> (i32, i32) {
    %c0_i32 = arith.constant 0 : i32
    %c0_i32_0 = arith.constant 0 : i32
    %c0_i32_1 = arith.constant 0 : i32
    return %c0_i32, %c0_i32_0 : i32, i32
  }
  func.func @transform_9(%arg0: i32) -> (i32, i32) {
    %c0_i32 = arith.constant 0 : i32
    %c0_i32_0 = arith.constant 0 : i32
    %c0_i32_1 = arith.constant 0 : i32
    return %c0_i32, %c0_i32_0 : i32, i32
  }
  func.func @transform_10(%arg0: i32) -> (i32, i32) {
    %c0_i32 = arith.constant 0 : i32
    %c0_i32_0 = arith.constant 0 : i32
    return %arg0, %c0_i32 : i32, i32
  }
}

</mosaic_0001>

<bundles_post_ra>
// kernel: testnet_forward.1
= control target key start
LH: loop header
LB: loop body
LE: loop exit
PB: predicated region body
PF: predicated region fallthrough
CT: control target
= control target key end

     0   :  { %15 = vsyncpa [#allocation3], 0  ;;  %s1096_s0 = inlined_call_operand.vmem [shape: f32[16,16], index: 0, kind: input, shape index: {}]   ;;  %s1097_s1 = inlined_call_operand.vmem [shape: f32[16,32], index: 1, kind: input, shape index: {}]   ;;  %s1098_s2 = inlined_call_operand.vmem [shape: bf16[16,256], index: 2, kind: input, shape index: {}]   ;;  %s1099_s3 = inlined_call_operand.vmem [shape: f32[1,256], index: 3, kind: input, shape index: {}]   ;;  %s1100_s4 = inlined_call_operand.vmem [shape: bf16[32,256], index: 4, kind: input, shape index: {}]   ;;  %s1101_s5 = inlined_call_operand.vmem [shape: f32[1,256], index: 5, kind: input, shape index: {}]   ;;  %s1102_s6 = inlined_call_operand.hbm [shape: bf16[256,256], index: 6, kind: input, shape index: {}]   ;;  %s1103_s7 = inlined_call_operand.vmem [shape: f32[1,256], index: 7, kind: input, shape index: {}]   ;;  %s1104_s8 = inlined_call_operand.hbm [shape: bf16[256,128], index: 8, kind: input, shape index: {}]   ;;  %s1105_s9 = inlined_call_operand.vmem [shape: f32[1,128], index: 9, kind: input, shape index: {}]   ;;  %s1106_s10 = inlined_call_operand.vmem [shape: f32[16,128], index: 10, kind: output, shape index: {}]  }
   0x1   :  { %s33_s15 = sshll.u32 %s1102_s6, 4  ;;  %s34_s15 = int_to_ptr.hbm [resolvable:$true] %s33_s15 }
   0x2   :  { %16 = vsyncpa [#allocation5], 0  ;;  %s961_s16 = smov [#allocation2]   ;;  %s48_s20 = sshll.u32 %s1104_s8, 4  ;;  %s49_s20 = int_to_ptr.hbm [resolvable:$true] %s48_s20 }
   0x3   :  { %s35_s17 = sshll.u32 %s961_s16, 4  ;;  %s962_s21 = smov 128   ;;  %s36_s17 = int_to_ptr.vmem [resolvable:$true] %s35_s17 }
   0x4   :  { %s963_s22 = smov 8   ;;  %s964_s23 = smov [#allocation4]  }
   0x5   :  { %41 = dma.hbm_to_vmem [thread:$0]  %s34_s15, 4096, %s36_s17, [#allocation3], %s962_s21, %s962_s21, %s963_s22  }
   0x6   :  { %s50_s24 = sshll.u32 %s964_s23, 4  ;;  %s965_s25 = smov 64   ;;  %s51_s24 = int_to_ptr.vmem [resolvable:$true] %s50_s24 }
   0x7   :  { %s966_s26 = smov 4  }
   0x8   :  { %56 = dma.hbm_to_vmem [thread:$0]  %s49_s20, 2048, %s51_s24, [#allocation5], %s965_s25, %s965_s25, %s966_s26  }
   0x9   :  { %957 = dma.done.wait [#allocation3], 4096  }
   0xa   :  { %958 = vsyncadd [#allocation3], 4294963200 }
   0xb   :  { %959 = dma.done.wait [#allocation5], 2048  }
   0xc   :  { %960 = vsyncadd [#allocation5], 4294965248  ;;  %v630_v0 = vld [vmem:[%s1098_s2] sm:$0xf]  ;;  %v849_v1 = vld [vmem:[%s1098_s2 + $0x4] sm:$0xf0] }
   0xd   :  { %v848_v2 = vld [vmem:[%s1098_s2 + $0x4] sm:$0xf]  ;;  %v631_v3 = vor.u32 %v849_v1, %v630_v0  ;;  %v632_v4 = vld [vmem:[%s1098_s2 + $0x8] sm:$0xf0]  ;;  %vm89_vm0 = vcmask 130048   ;;  %vm158_vm1 = vcmask 261120  }
   0xe   :  { %v68_v5 = vld [vmem:[%s1096_s0] sm:$0xff]  ;;  %v69_v6 = vld [vmem:[%s1096_s0 + $0x8] sm:$0xff]  ;;  %v635_v7 = vor.u32 %v848_v2, %v632_v4  ;;  %v648_v9 = vld [vmem:[%s1100_s4 + $0x10] sm:$0xf] }
   0xf   :  { %v70_v8 = vpack.c.bf16 %v69_v6, %v68_v5  ;;  %v853_v10 = vld [vmem:[%s1100_s4 + $0x14] sm:$0xf0]  ;;  %v852_v11 = vld [vmem:[%s1100_s4 + $0x14] sm:$0xf]  ;;  %100 = vmatpush.bf16.msra.mxu2 %v631_v3  ;;  %v650_v13 = vld [vmem:[%s1100_s4 + $0x18] sm:$0xf0] }
  0x10   :  { %v649_v12 = vor.u32 %v853_v10, %v648_v9  ;;  %v640_v14 = vld [vmem:[%s1100_s4] sm:$0xf]  ;;  %v851_v15 = vld [vmem:[%s1100_s4 + $0x4] sm:$0xf0]  ;;  %114 = vmatpush.bf16.msra.mxu3 %v635_v7  ;;  %v653_v16 = vor.u32 %v852_v11, %v650_v13  ;;  %v850_v17 = vld [vmem:[%s1100_s4 + $0x4] sm:$0xf] }
  0x11   :  { %v642_v18 = vld [vmem:[%s1100_s4 + $0x8] sm:$0xf0]  ;;  %v641_v19 = vor.u32 %v851_v15, %v640_v14  ;;  %v125_v21 = vld [vmem:[%s1097_s1] sm:$0xff]  ;;  %v714_v24 = vld [vmem:[#allocation2 + $0x70] sm:$0xf] }
  0x12   :  { %636 = vmatmul.msk.bf16.vlgmr.msra.gmra.mxu2 %vm89_vm0, %v70_v8  ;;  %v645_v20 = vor.u32 %v850_v17, %v642_v18  ;;  %v126_v22 = vld [vmem:[%s1097_s1 + $0x8] sm:$0xff]  ;;  %v869_v25 = vld [vmem:[#allocation2 + $0x74] sm:$0xf0]  ;;  %v778_v26 = vld [vmem:[#allocation2 + $0xf0] sm:$0xf] }
  0x13   :  { %168 = vmatpush.bf16.msrb.mxu2 %v649_v12  ;;  %637 = vmatmul.msk.bf16.vlgmr.msra.gmra.mxu3 %vm89_vm0, %v70_v8  ;;  %v127_v23 = vpack.c.bf16 %v126_v22, %v125_v21  ;;  %v715_v27 = vor.u32 %v869_v25, %v714_v24  ;;  %v885_v28 = vld [vmem:[#allocation2 + $0xf4] sm:$0xf0]  ;;  %v868_v29 = vld [vmem:[#allocation2 + $0x74] sm:$0xf]  ;;  %v716_v30 = vld [vmem:[#allocation2 + $0x78] sm:$0xf0] }
  0x14   :  { %182 = vmatpush.bf16.msrb.mxu3 %v653_v16  ;;  %v779_v31 = vor.u32 %v885_v28, %v778_v26  ;;  %v719_v32 = vor.u32 %v868_v29, %v716_v30  ;;  %v884_v33 = vld [vmem:[#allocation2 + $0xf4] sm:$0xf]  ;;  %v780_v34 = vld [vmem:[#allocation2 + $0xf8] sm:$0xf0]  ;;  %v706_v36 = vld [vmem:[#allocation2 + $0x60] sm:$0xf] }
  0x15   :  { %398 = vmatpush.bf16.msra.mxu0 %v715_v27  ;;  %v783_v35 = vor.u32 %v884_v33, %v780_v34  ;;  %v867_v37 = vld [vmem:[#allocation2 + $0x64] sm:$0xf0]  ;;  %v770_v38 = vld [vmem:[#allocation2 + $0xe0] sm:$0xf]  ;;  %v866_v41 = vld [vmem:[#allocation2 + $0x64] sm:$0xf] }
  0x16   :  { %412 = vmatpush.bf16.msra.mxu1 %v779_v31  ;;  %v707_v39 = vor.u32 %v867_v37, %v706_v36  ;;  %v883_v40 = vld [vmem:[#allocation2 + $0xe4] sm:$0xf0]  ;;  %v708_v42 = vld [vmem:[#allocation2 + $0x68] sm:$0xf0]  ;;  %v882_v45 = vld [vmem:[#allocation2 + $0xe4] sm:$0xf] }
  0x17   :  { %169 = vmatpush.bf16.msrb.mxu2 %v641_v19  ;;  %v771_v43 = vor.u32 %v883_v40, %v770_v38  ;;  %v711_v44 = vor.u32 %v866_v41, %v708_v42  ;;  %v772_v46 = vld [vmem:[#allocation2 + $0xe8] sm:$0xf0]  ;;  %v698_v48 = vld [vmem:[#allocation2 + $0x50] sm:$0xf]  ;;  %v865_v49 = vld [vmem:[#allocation2 + $0x54] sm:$0xf0] }
  0x18   :  { %183 = vmatpush.bf16.msrb.mxu3 %v645_v20  ;;  %v775_v47 = vor.u32 %v882_v45, %v772_v46  ;;  %v762_v50 = vld [vmem:[#allocation2 + $0xd0] sm:$0xf]  ;;  %v699_v51 = vor.u32 %v865_v49, %v698_v48  ;;  %v881_v52 = vld [vmem:[#allocation2 + $0xd4] sm:$0xf0]  ;;  %v864_v53 = vld [vmem:[#allocation2 + $0x54] sm:$0xf] }
  0x19   :  { %399 = vmatpush.bf16.msra.mxu0 %v707_v39  ;;  %v700_v54 = vld [vmem:[#allocation2 + $0x58] sm:$0xf0]  ;;  %v763_v55 = vor.u32 %v881_v52, %v762_v50  ;;  %v880_v57 = vld [vmem:[#allocation2 + $0xd4] sm:$0xf]  ;;  %v690_v60 = vld [vmem:[#allocation2 + $0x40] sm:$0xf] }
  0x1a   :  { %413 = vmatpush.bf16.msra.mxu1 %v771_v43  ;;  %v703_v56 = vor.u32 %v864_v53, %v700_v54  ;;  %v764_v58 = vld [vmem:[#allocation2 + $0xd8] sm:$0xf0]  ;;  %v863_v61 = vld [vmem:[#allocation2 + $0x44] sm:$0xf0]  ;;  %v754_v62 = vld [vmem:[#allocation2 + $0xc0] sm:$0xf] }
  0x1b   :  { %426 = vmatpush.bf16.msra.mxu2 %v719_v32  ;;  %v767_v59 = vor.u32 %v880_v57, %v764_v58  ;;  %v691_v63 = vor.u32 %v863_v61, %v690_v60  ;;  %v879_v0 = vld [vmem:[#allocation2 + $0xc4] sm:$0xf0]  ;;  %v862_v1 = vld [vmem:[#allocation2 + $0x44] sm:$0xf]  ;;  %v692_v2 = vld [vmem:[#allocation2 + $0x48] sm:$0xf0] }
  0x1c   :  { %440 = vmatpush.bf16.msra.mxu3 %v783_v35  ;;  %v755_v3 = vor.u32 %v879_v0, %v754_v62  ;;  %v695_v4 = vor.u32 %v862_v1, %v692_v2  ;;  %v878_v5 = vld [vmem:[#allocation2 + $0xc4] sm:$0xf]  ;;  %v756_v6 = vld [vmem:[#allocation2 + $0xc8] sm:$0xf0]  ;;  %v682_v8 = vld [vmem:[#allocation2 + $0x30] sm:$0xf] }
  0x1d   :  { %400 = vmatpush.bf16.msra.mxu0 %v699_v51  ;;  %v759_v7 = vor.u32 %v878_v5, %v756_v6  ;;  %v861_v9 = vld [vmem:[#allocation2 + $0x34] sm:$0xf0]  ;;  %v746_v11 = vld [vmem:[#allocation2 + $0xb0] sm:$0xf]  ;;  %v860_v13 = vld [vmem:[#allocation2 + $0x34] sm:$0xf] }
  0x1e   :  { %414 = vmatpush.bf16.msra.mxu1 %v763_v55  ;;  %v683_v10 = vor.u32 %v861_v9, %v682_v8  ;;  %v877_v12 = vld [vmem:[#allocation2 + $0xb4] sm:$0xf0]  ;;  %v684_v15 = vld [vmem:[#allocation2 + $0x38] sm:$0xf0]  ;;  %v876_v16 = vld [vmem:[#allocation2 + $0xb4] sm:$0xf] }
  0x1f   :  { %427 = vmatpush.bf16.msra.mxu2 %v711_v44  ;;  %v747_v14 = vor.u32 %v877_v12, %v746_v11  ;;  %v748_v17 = vld [vmem:[#allocation2 + $0xb8] sm:$0xf0]  ;;  %v687_v18 = vor.u32 %v860_v13, %v684_v15  ;;  %v674_v20 = vld [vmem:[#allocation2 + $0x20] sm:$0xf]  ;;  %v859_v21 = vld [vmem:[#allocation2 + $0x24] sm:$0xf0] }
  0x20   :  { %441 = vmatpush.bf16.msra.mxu3 %v775_v47  ;;  %v751_v19 = vor.u32 %v876_v16, %v748_v17  ;;  %v738_v22 = vld [vmem:[#allocation2 + $0xa0] sm:$0xf]  ;;  %v875_v24 = vld [vmem:[#allocation2 + $0xa4] sm:$0xf0]  ;;  %v858_v25 = vld [vmem:[#allocation2 + $0x24] sm:$0xf] }
  0x21   :  { %401 = vmatpush.bf16.msra.mxu0 %v691_v63  ;;  %v676_v26 = vld [vmem:[#allocation2 + $0x28] sm:$0xf0]  ;;  %v739_v27 = vor.u32 %v875_v24, %v738_v22  ;;  %v874_v29 = vld [vmem:[#allocation2 + $0xa4] sm:$0xf]  ;;  %v666_v32 = vld [vmem:[#allocation2 + $0x10] sm:$0xf] }
  0x22   :  { %654 = vmatmul.msk.bf16.vlgmr.msrb.gmra.mxu2 %vm158_vm1, %v127_v23  ;;  %415 = vmatpush.bf16.msra.mxu1 %v755_v3  ;;  %v679_v28 = vor.u32 %v858_v25, %v676_v26  ;;  %v740_v30 = vld [vmem:[#allocation2 + $0xa8] sm:$0xf0]  ;;  %v857_v33 = vld [vmem:[#allocation2 + $0x14] sm:$0xf0]  ;;  %v730_v34 = vld [vmem:[#allocation2 + $0x90] sm:$0xf] }
  0x23   :  { %655 = vmatmul.msk.bf16.vlgmr.msrb.gmra.mxu3 %vm158_vm1, %v127_v23  ;;  %428 = vmatpush.bf16.msra.mxu2 %v703_v56  ;;  %v675_v23 = vor.u32 %v859_v21, %v674_v20  ;;  %v743_v31 = vor.u32 %v874_v29, %v740_v30  ;;  %v667_v35 = vor.u32 %v857_v33, %v666_v32  ;;  %v873_v36 = vld [vmem:[#allocation2 + $0x94] sm:$0xf0]  ;;  %v856_v37 = vld [vmem:[#allocation2 + $0x14] sm:$0xf]  ;;  %v668_v38 = vld [vmem:[#allocation2 + $0x18] sm:$0xf0] }
  0x24   :  { %442 = vmatpush.bf16.msra.mxu3 %v767_v59  ;;  %v731_v39 = vor.u32 %v873_v36, %v730_v34  ;;  %v671_v40 = vor.u32 %v856_v37, %v668_v38  ;;  %v872_v41 = vld [vmem:[#allocation2 + $0x94] sm:$0xf]  ;;  %v732_v42 = vld [vmem:[#allocation2 + $0x98] sm:$0xf0]  ;;  %v658_v44 = vld [vmem:[#allocation2] sm:$0xf] }
  0x25   :  { %402 = vmatpush.bf16.msra.mxu0 %v683_v10  ;;  %v735_v43 = vor.u32 %v872_v41, %v732_v42  ;;  %v855_v45 = vld [vmem:[#allocation2 + $0x4] sm:$0xf0]  ;;  %v722_v46 = vld [vmem:[#allocation2 + $0x80] sm:$0xf]  ;;  %v854_v49 = vld [vmem:[#allocation2 + $0x4] sm:$0xf] }
  0x26   :  { %416 = vmatpush.bf16.msra.mxu1 %v747_v14  ;;  %v659_v47 = vor.u32 %v855_v45, %v658_v44  ;;  %v871_v48 = vld [vmem:[#allocation2 + $0x84] sm:$0xf0]  ;;  %v660_v50 = vld [vmem:[#allocation2 + $0x8] sm:$0xf0]  ;;  %v870_v53 = vld [vmem:[#allocation2 + $0x84] sm:$0xf] }
  0x27   :  { %429 = vmatpush.bf16.msra.mxu2 %v695_v4  ;;  %v723_v51 = vor.u32 %v871_v48, %v722_v46  ;;  %v663_v52 = vor.u32 %v854_v49, %v660_v50  ;;  %v724_v54 = vld [vmem:[#allocation2 + $0x88] sm:$0xf0]  ;;  %v893_v58 = vld [vmem:[#allocation4 + $0x38] sm:$0xff]  ;;  %v892_v60 = vld [vmem:[#allocation4 + $0x30] sm:$0xff] }
  0x28   :  { %443 = vmatpush.bf16.msra.mxu3 %v759_v7  ;;  %v727_v55 = vor.u32 %v870_v53, %v724_v54  ;;  %v901_v59 = vld [vmem:[#allocation4 + $0x78] sm:$0xff]  ;;  %v900_v61 = vld [vmem:[#allocation4 + $0x70] sm:$0xff]  ;;  %v891_v63 = vld [vmem:[#allocation4 + $0x28] sm:$0xff] }
  0x29   :  { %403 = vmatpush.bf16.msra.mxu0 %v675_v23  ;;  %v890_v1 = vld [vmem:[#allocation4 + $0x20] sm:$0xff]  ;;  %v899_v34 = vld [vmem:[#allocation4 + $0x68] sm:$0xff]  ;;  %v888_v37 = vld [vmem:[#allocation4 + $0x10] sm:$0xff] }
  0x2a   :  { %417 = vmatpush.bf16.msra.mxu1 %v739_v27  ;;  %v132_v2 = vld [vmem:[%s1101_s5] sm:$0x3]  ;;  %v897_v38 = vld [vmem:[#allocation4 + $0x58] sm:$0xff]  ;;  %v895_v42 = vld [vmem:[#allocation4 + $0x48] sm:$0xff] }
  0x2b   :  { %430 = vmatpush.bf16.msra.mxu2 %v687_v18  ;;  %v73_v3 = vld [vmem:[%s1099_s3] sm:$0x3]  ;;  %v134_v5 = vperm.slane %v132_v2, 0  ;;  %v135_v7 = vperm.slane %v132_v2, 1 }
  0x2c   :  { %444 = vmatpush.bf16.msra.mxu3 %v751_v19  ;;  %v75_v8 = vperm.slane %v73_v3, 0  ;;  %v76_v9 = vperm.slane %v73_v3, 1  ;;  %v898_v36 = vld [vmem:[#allocation4 + $0x60] sm:$0xff] }
  0x2d   :  { %404 = vmatpush.bf16.msra.mxu0 %v667_v35  ;;  %v889_v35 = vld [vmem:[#allocation4 + $0x18] sm:$0xff]  ;;  %v886_v41 = vld [vmem:[#allocation4] sm:$0xff] }
  0x2e   :  { %418 = vmatpush.bf16.msra.mxu1 %v731_v39  ;;  %v887_v39 = vld [vmem:[#allocation4 + $0x8] sm:$0xff]  ;;  %v232_v44 = vld [vmem:[%s1103_s7] sm:$0x3] }
  0x2f   :  { %431 = vmatpush.bf16.msra.mxu2 %v679_v28  ;;  %v234_v46 = vperm.slane %v232_v44, 0  ;;  %v235_v50 = vperm.slane %v232_v44, 1 }
  0x30   :  { %445 = vmatpush.bf16.msra.mxu3 %v743_v31 }
  0x31   :  { %405 = vmatpush.bf16.msra.mxu0 %v659_v47 }
  0x32   :  { %419 = vmatpush.bf16.msra.mxu1 %v723_v51 }
  0x33   :  { %432 = vmatpush.bf16.msra.mxu2 %v671_v40  ;;  %v896_v40 = vld [vmem:[#allocation4 + $0x50] sm:$0xff] }
  0x34   :  { %446 = vmatpush.bf16.msra.mxu3 %v735_v43  ;;  %v894_v43 = vld [vmem:[#allocation4 + $0x40] sm:$0xff] }
  0x35   :  { %592 = vmatpush.bf16.msrb.mxu0 %v893_v58 }
  0x36   :  { %606 = vmatpush.bf16.msrb.mxu1 %v901_v59 }
  0x37   :  { %433 = vmatpush.bf16.msra.mxu2 %v663_v52 }
  0x38   :  { %447 = vmatpush.bf16.msra.mxu3 %v727_v55 }
  0x39   :  { %593 = vmatpush.bf16.msrb.mxu0 %v892_v60 }
  0x3a   :  { %607 = vmatpush.bf16.msrb.mxu1 %v900_v61 }
  0x3d   :  { %594 = vmatpush.bf16.msrb.mxu0 %v891_v63 }
  0x3e   :  { %608 = vmatpush.bf16.msrb.mxu1 %v899_v34 }
  0x41   :  { %595 = vmatpush.bf16.msrb.mxu0 %v890_v1 }
  0x42   :  { %609 = vmatpush.bf16.msrb.mxu1 %v898_v36 }
  0x45   :  { %596 = vmatpush.bf16.msrb.mxu0 %v889_v35 }
  0x46   :  { %610 = vmatpush.bf16.msrb.mxu1 %v897_v38 }
  0x49   :  { %597 = vmatpush.bf16.msrb.mxu0 %v888_v37 }
  0x4a   :  { %611 = vmatpush.bf16.msrb.mxu1 %v896_v40 }
  0x4d   :  { %598 = vmatpush.bf16.msrb.mxu0 %v887_v39 }
  0x4e   :  { %612 = vmatpush.bf16.msrb.mxu1 %v895_v42 }
  0x51   :  { %599 = vmatpush.bf16.msrb.mxu0 %v886_v41 }
  0x52   :  { %613 = vmatpush.bf16.msrb.mxu1 %v894_v43 }
  0x95   :  { %v102_v56 = vpop.f32.mrf.mxu2 }
  0x96   :  { %v116_v57 = vpop.f32.mrf.mxu3  ;;  %v103_v12 = vadd.f32 %v102_v56, %v75_v8 }
  0x97   :  { %v117_v14 = vadd.f32 %v116_v57, %v76_v9 }
  0x98   :  { %v121_v22 = vmax.f32 %v103_v12, 0.0 }
  0x99   :  { %v122_v25 = vmax.f32 %v117_v14, 0.0 }
  0x9d   :  { %v104_v62 = vpop.f32.mrf.mxu2 }
  0x9e   :  { %v118_v0 = vpop.f32.mrf.mxu3  ;;  %v105_v13 = vadd.f32 %v104_v62, %v75_v8 }
  0x9f   :  { %v119_v15 = vadd.f32 %v118_v0, %v76_v9 }
  0xa0   :  { %v123_v23 = vmax.f32 %v105_v13, 0.0 }
  0xa1   :  { %v124_v26 = vmax.f32 %v119_v15, 0.0 }
  0xa5   :  { %v171_v4 = vpop.f32.mrf.mxu2 }
  0xa6   :  { %v185_v6 = vpop.f32.mrf.mxu3  ;;  %v172_v10 = vadd.f32 %v171_v4, %v134_v5 }
  0xa7   :  { %v186_v11 = vadd.f32 %v185_v6, %v135_v7  ;;  %v908_v6 = vld [vmem:[%s1105_s9] ss:$0 sm:$0xff] }
  0xa8   :  { %v190_v17 = vmax.f32 %v172_v10, 0.0 }
  0xa9   :  { %v191_v20 = vmax.f32 %v186_v11, 0.0 }
  0xaa   :  { %v194_v28 = vadd.f32 %v190_v17, %v121_v22 }
  0xab   :  { %v195_v30 = vadd.f32 %v191_v20, %v122_v25 }
  0xad   :  { %v173_v16 = vpop.f32.mrf.mxu2 }
  0xae   :  { %v174_v18 = vadd.f32 %v173_v16, %v134_v5  ;;  %v187_v19 = vpop.f32.mrf.mxu3 }
  0xaf   :  { %v188_v21 = vadd.f32 %v187_v19, %v135_v7 }
  0xb0   :  { %v192_v24 = vmax.f32 %v174_v18, 0.0 }
  0xb1   :  { %v193_v27 = vmax.f32 %v188_v21, 0.0 }
  0xb2   :  { %v196_v29 = vadd.f32 %v192_v24, %v123_v23 }
  0xb3   :  { %v197_v31 = vadd.f32 %v193_v27, %v124_v26 }
  0xb4   :  { %v198_v32 = vpack.c.bf16 %v196_v29, %v194_v28 }
  0xb5   :  { %v199_v33 = vpack.c.bf16 %v197_v31, %v195_v30 }
  0xb6   :  { %406 = vmatmul.bf16.vlgmr.msra.gmra.mxu0 %v198_v32  ;;  %434 = vmatmul.bf16.vlgmr.msra.gmra.mxu2 %v198_v32 }
  0xb7   :  { %420 = vmatmul.bf16.vlgmr.msra.gmra.mxu1 %v199_v33  ;;  %448 = vmatmul.bf16.vlgmr.msra.gmra.mxu3 %v199_v33 }
 0x133   :  { %v407_v45 = vpop.f32.mrf.mxu0 }
 0x134   :  { %v421_v47 = vpop.f32.mrf.mxu1  ;;  %v408_v48 = vadd.f32 %v407_v45, %v234_v46 }
 0x136   :  { %v422_v53 = vadd.f32 %v421_v47, %v408_v48 }
 0x138   :  { %v454_v58 = vmax.f32 %v422_v53, 0.0 }
 0x139   :  { %v435_v49 = vpop.f32.mrf.mxu2 }
 0x13a   :  { %v449_v51 = vpop.f32.mrf.mxu3  ;;  %v436_v56 = vadd.f32 %v435_v49, %v235_v50 }
 0x13b   :  { %v409_v52 = vpop.f32.mrf.mxu0 }
 0x13c   :  { %v410_v54 = vadd.f32 %v409_v52, %v234_v46  ;;  %v423_v55 = vpop.f32.mrf.mxu1  ;;  %v450_v61 = vadd.f32 %v449_v51, %v436_v56 }
 0x13e   :  { %v424_v57 = vadd.f32 %v423_v55, %v410_v54  ;;  %v455_v2 = vmax.f32 %v450_v61, 0.0 }
 0x140   :  { %v456_v59 = vmax.f32 %v424_v57, 0.0 }
 0x141   :  { %v437_v60 = vpop.f32.mrf.mxu2 }
 0x142   :  { %v458_v62 = vpack.c.bf16 %v456_v59, %v454_v58  ;;  %v438_v63 = vadd.f32 %v437_v60, %v235_v50  ;;  %v451_v0 = vpop.f32.mrf.mxu3 }
 0x144   :  { %v452_v1 = vadd.f32 %v451_v0, %v438_v63  ;;  %600 = vmatmul.bf16.vlgmr.msrb.gmra.mxu0 %v458_v62 }
 0x146   :  { %v457_v3 = vmax.f32 %v452_v1, 0.0 }
 0x148   :  { %v459_v4 = vpack.c.bf16 %v457_v3, %v455_v2 }
 0x14a   :  { %614 = vmatmul.bf16.vlgmr.msrb.gmra.mxu1 %v459_v4 }
 0x1c1   :  { %v601_v5 = vpop.f32.mrf.mxu0 }
 0x1c2   :  { %v602_v7 = vadd.f32 %v908_v6, %v601_v5 }
 0x1c7   :  { %v615_v8 = vpop.f32.mrf.mxu1 }
 0x1c8   :  { %v616_v9 = vadd.f32 %v615_v8, %v602_v7 }
 0x1c9   :  { %v603_v10 = vpop.f32.mrf.mxu0 }
 0x1ca   :  { %620 = vst [vmem:[%s1106_s10] sm:$0xff] %v616_v9  ;;  %v604_v11 = vadd.f32 %v908_v6, %v603_v10 }
 0x1cf   :  { %v617_v12 = vpop.f32.mrf.mxu1 }
 0x1d0   :  { %v618_v13 = vadd.f32 %v617_v12, %v604_v11 }
 0x1d2   :  { %621 = vst [vmem:[%s1106_s10 + $0x8] sm:$0xff] %v618_v13 }
 0x1d3   :  { %626 = vsyncpa [#allocation3], 1 }
 0x1d4   :  { %627 = vsyncpa [#allocation5], 1 }

</bundles_post_ra>
